<compile_context>
chip_gen: v7x
topology: tpu7x:2x2x1
jax: 0.10.0
libtpu: 0.0.40
codegen_flags: <defaults>
</compile_context>

<pallas_src>
import jax
import jax.numpy as jnp
from jax.experimental import pallas as pl
from jax.experimental.pallas import tpu as pltpu

# Packed-parameter layout (flat f32[41]):
#   w1 (4,6) row-major @ 0,  b1 (4,) @ 24,
#   w2 (2,4) row-major @ 28, b2 (2,) @ 36,
#   w3 (1,2) row-major @ 38, b3 (1,) @ 40.
_W1, _B1 = 0, 24
_W2, _B2 = 28, 36
_W3, _B3 = 38, 40
_N_PARAMS = 41


def mlp_kernel(p_ref, x_ref, o_ref):
    # x_ref: (6, TB) -- features on sublanes, batch on lanes.
    x_rows = [x_ref[k:k + 1, :] for k in range(6)]          # each (1, TB)

    # fc1 + relu: 4 outputs, K=6 -> unrolled VPU FMAs (scalars from SMEM).
    h1 = []
    for j in range(4):
        acc = x_rows[0] * p_ref[_W1 + 6 * j] + p_ref[_B1 + j]
        for k in range(1, 6):
            acc = acc + x_rows[k] * p_ref[_W1 + 6 * j + k]
        h1.append(jnp.maximum(acc, 0.0))

    # fc2 + relu: 2 outputs, K=4.
    h2 = []
    for j in range(2):
        acc = h1[0] * p_ref[_W2 + 4 * j] + p_ref[_B2 + j]
        for k in range(1, 4):
            acc = acc + h1[k] * p_ref[_W2 + 4 * j + k]
        h2.append(jnp.maximum(acc, 0.0))

    # fc3 + sigmoid: 1 output, K=2.  sigmoid(z) = 0.5*tanh(0.5*z)+0.5 keeps the
    # epilogue on the otherwise-idle EUP slot (no full-precision VPU divide).
    z = h2[0] * p_ref[_W3 + 0] + p_ref[_B3]
    z = z + h2[1] * p_ref[_W3 + 1]
    o_ref[...] = 0.5 * jnp.tanh(0.5 * z) + 0.5


def pack_params(params):
    (w1, b1), (w2, b2), (w3, b3) = params
    return jnp.concatenate([
        w1.reshape(-1), b1.reshape(-1),
        w2.reshape(-1), b2.reshape(-1),
        w3.reshape(-1), b3.reshape(-1),
    ]).astype(jnp.float32)


def _batch_tile(B):
    # Single block for small B; otherwise the largest lane-dense tile
    # (<= 2048 lanes, multiple of 128) that divides B exactly.
    if B <= 2048 or B % 128 != 0:
        return B
    tb = 2048
    while B % tb != 0:
        tb -= 128
    return tb


def net_forward(x, params):
    B = x.shape[0]
    xt = x.astype(jnp.float32).T               # (6, B): batch -> lane axis
    packed = pack_params(params)               # flat f32[41] -> SMEM
    tb = _batch_tile(B)
    grid = (pl.cdiv(B, tb),)

    out = pl.pallas_call(
        mlp_kernel,
        out_shape=jax.ShapeDtypeStruct((1, B), jnp.float32),
        grid=grid,
        in_specs=[
            pl.BlockSpec(memory_space=pltpu.MemorySpace.SMEM),   # packed params
            pl.BlockSpec((6, tb), lambda i: (0, i)),             # x tile
        ],
        out_specs=pl.BlockSpec((1, tb), lambda i: (0, i)),
        compiler_params=pltpu.CompilerParams(
            dimension_semantics=("parallel",)),
    )(packed, xt)
    return out.reshape(B, 1)                   # back to torch's (B, 1) layout


def init_linear(key, in_features, out_features):
    # Deterministic init mimicking torch.nn.Linear (uniform(-1/sqrt(in), 1/sqrt(in)))
    kw, kb = jax.random.split(key)
    bound = 1.0 / jnp.sqrt(jnp.float32(in_features))
    w = jax.random.uniform(kw, (out_features, in_features), jnp.float32, -bound, bound)
    b = jax.random.uniform(kb, (out_features,), jnp.float32, -bound, bound)
    return w, b


if __name__ == "__main__":
    key = jax.random.PRNGKey(0)
    k_x, k1, k2, k3 = jax.random.split(key, 4)

    batch = 8
    x = jax.random.normal(k_x, (batch, 6), jnp.float32)

    params = (
        init_linear(k1, 6, 4),
        init_linear(k2, 4, 2),
        init_linear(k3, 2, 1),
    )

    out = jax.block_until_ready(net_forward(x, params))

    # Pure-JAX reference check
    (w1, b1), (w2, b2), (w3, b3) = params
    h = jnp.maximum(x @ w1.T + b1, 0.0)
    h = jnp.maximum(h @ w2.T + b2, 0.0)
    ref = jax.nn.sigmoid(h @ w3.T + b3)
    assert out.shape == (batch, 1)
    assert jnp.allclose(out, ref, atol=1e-5), "mismatch vs reference"

    print("KERNEL_OK")
</pallas_src>

<mosaic_0001>
module attributes {stable_mosaic.version = 11 : i64} {
  func.func @mlp_kernel(%arg0: i32, %arg1: memref<41xf32, #tpu.memory_space<smem>>, %arg2: memref<6x8xf32, #tpu.memory_space<vmem>>, %arg3: memref<1x8xf32, #tpu.memory_space<vmem>>) attributes {dimension_semantics = [#tpu.dimension_semantics<parallel>], iteration_bounds = array<i64: 1>, scalar_prefetch = 0 : i64, scratch_operands = 0 : i64, tpu.core_type = #tpu.core_type<tc>, window_params = [{transform_indices = @transform_0, window_bounds = array<i64: 41>}, {transform_indices = @transform_1, window_bounds = array<i64: 6, 8>}, {transform_indices = @transform_2, window_bounds = array<i64: 1, 8>}]} {
    %c0 = arith.constant 0 : index
    %c0_0 = arith.constant 0 : index
    %0 = vector.load %arg2[%c0, %c0_0] : memref<6x8xf32, #tpu.memory_space<vmem>>, vector<1x8xf32>
    %c1 = arith.constant 1 : index
    %c0_1 = arith.constant 0 : index
    %1 = vector.load %arg2[%c1, %c0_1] : memref<6x8xf32, #tpu.memory_space<vmem>>, vector<1x8xf32>
    %c2 = arith.constant 2 : index
    %c0_2 = arith.constant 0 : index
    %2 = vector.load %arg2[%c2, %c0_2] : memref<6x8xf32, #tpu.memory_space<vmem>>, vector<1x8xf32>
    %c3 = arith.constant 3 : index
    %c0_3 = arith.constant 0 : index
    %3 = vector.load %arg2[%c3, %c0_3] : memref<6x8xf32, #tpu.memory_space<vmem>>, vector<1x8xf32>
    %c4 = arith.constant 4 : index
    %c0_4 = arith.constant 0 : index
    %4 = vector.load %arg2[%c4, %c0_4] : memref<6x8xf32, #tpu.memory_space<vmem>>, vector<1x8xf32>
    %c5 = arith.constant 5 : index
    %c0_5 = arith.constant 0 : index
    %5 = vector.load %arg2[%c5, %c0_5] : memref<6x8xf32, #tpu.memory_space<vmem>>, vector<1x8xf32>
    %c0_6 = arith.constant 0 : index
    %6 = memref.load %arg1[%c0_6] : memref<41xf32, #tpu.memory_space<smem>>
    %7 = vector.broadcast %6 : f32 to vector<1x8xf32>
    %8 = arith.mulf %0, %7 : vector<1x8xf32>
    %c24 = arith.constant 24 : index
    %9 = memref.load %arg1[%c24] : memref<41xf32, #tpu.memory_space<smem>>
    %10 = vector.broadcast %9 : f32 to vector<1x8xf32>
    %11 = arith.addf %8, %10 : vector<1x8xf32>
    %c1_7 = arith.constant 1 : index
    %12 = memref.load %arg1[%c1_7] : memref<41xf32, #tpu.memory_space<smem>>
    %13 = vector.broadcast %12 : f32 to vector<1x8xf32>
    %14 = arith.mulf %1, %13 : vector<1x8xf32>
    %15 = arith.addf %11, %14 : vector<1x8xf32>
    %c2_8 = arith.constant 2 : index
    %16 = memref.load %arg1[%c2_8] : memref<41xf32, #tpu.memory_space<smem>>
    %17 = vector.broadcast %16 : f32 to vector<1x8xf32>
    %18 = arith.mulf %2, %17 : vector<1x8xf32>
    %19 = arith.addf %15, %18 : vector<1x8xf32>
    %c3_9 = arith.constant 3 : index
    %20 = memref.load %arg1[%c3_9] : memref<41xf32, #tpu.memory_space<smem>>
    %21 = vector.broadcast %20 : f32 to vector<1x8xf32>
    %22 = arith.mulf %3, %21 : vector<1x8xf32>
    %23 = arith.addf %19, %22 : vector<1x8xf32>
    %c4_10 = arith.constant 4 : index
    %24 = memref.load %arg1[%c4_10] : memref<41xf32, #tpu.memory_space<smem>>
    %25 = vector.broadcast %24 : f32 to vector<1x8xf32>
    %26 = arith.mulf %4, %25 : vector<1x8xf32>
    %27 = arith.addf %23, %26 : vector<1x8xf32>
    %c5_11 = arith.constant 5 : index
    %28 = memref.load %arg1[%c5_11] : memref<41xf32, #tpu.memory_space<smem>>
    %29 = vector.broadcast %28 : f32 to vector<1x8xf32>
    %30 = arith.mulf %5, %29 : vector<1x8xf32>
    %31 = arith.addf %27, %30 : vector<1x8xf32>
    %cst = arith.constant 0.000000e+00 : f32
    %32 = vector.broadcast %cst : f32 to vector<1x8xf32>
    %33 = arith.maximumf %31, %32 : vector<1x8xf32>
    %c6 = arith.constant 6 : index
    %34 = memref.load %arg1[%c6] : memref<41xf32, #tpu.memory_space<smem>>
    %35 = vector.broadcast %34 : f32 to vector<1x8xf32>
    %36 = arith.mulf %0, %35 : vector<1x8xf32>
    %c25 = arith.constant 25 : index
    %37 = memref.load %arg1[%c25] : memref<41xf32, #tpu.memory_space<smem>>
    %38 = vector.broadcast %37 : f32 to vector<1x8xf32>
    %39 = arith.addf %36, %38 : vector<1x8xf32>
    %c7 = arith.constant 7 : index
    %40 = memref.load %arg1[%c7] : memref<41xf32, #tpu.memory_space<smem>>
    %41 = vector.broadcast %40 : f32 to vector<1x8xf32>
    %42 = arith.mulf %1, %41 : vector<1x8xf32>
    %43 = arith.addf %39, %42 : vector<1x8xf32>
    %c8 = arith.constant 8 : index
    %44 = memref.load %arg1[%c8] : memref<41xf32, #tpu.memory_space<smem>>
    %45 = vector.broadcast %44 : f32 to vector<1x8xf32>
    %46 = arith.mulf %2, %45 : vector<1x8xf32>
    %47 = arith.addf %43, %46 : vector<1x8xf32>
    %c9 = arith.constant 9 : index
    %48 = memref.load %arg1[%c9] : memref<41xf32, #tpu.memory_space<smem>>
    %49 = vector.broadcast %48 : f32 to vector<1x8xf32>
    %50 = arith.mulf %3, %49 : vector<1x8xf32>
    %51 = arith.addf %47, %50 : vector<1x8xf32>
    %c10 = arith.constant 10 : index
    %52 = memref.load %arg1[%c10] : memref<41xf32, #tpu.memory_space<smem>>
    %53 = vector.broadcast %52 : f32 to vector<1x8xf32>
    %54 = arith.mulf %4, %53 : vector<1x8xf32>
    %55 = arith.addf %51, %54 : vector<1x8xf32>
    %c11 = arith.constant 11 : index
    %56 = memref.load %arg1[%c11] : memref<41xf32, #tpu.memory_space<smem>>
    %57 = vector.broadcast %56 : f32 to vector<1x8xf32>
    %58 = arith.mulf %5, %57 : vector<1x8xf32>
    %59 = arith.addf %55, %58 : vector<1x8xf32>
    %cst_12 = arith.constant 0.000000e+00 : f32
    %60 = vector.broadcast %cst_12 : f32 to vector<1x8xf32>
    %61 = arith.maximumf %59, %60 : vector<1x8xf32>
    %c12 = arith.constant 12 : index
    %62 = memref.load %arg1[%c12] : memref<41xf32, #tpu.memory_space<smem>>
    %63 = vector.broadcast %62 : f32 to vector<1x8xf32>
    %64 = arith.mulf %0, %63 : vector<1x8xf32>
    %c26 = arith.constant 26 : index
    %65 = memref.load %arg1[%c26] : memref<41xf32, #tpu.memory_space<smem>>
    %66 = vector.broadcast %65 : f32 to vector<1x8xf32>
    %67 = arith.addf %64, %66 : vector<1x8xf32>
    %c13 = arith.constant 13 : index
    %68 = memref.load %arg1[%c13] : memref<41xf32, #tpu.memory_space<smem>>
    %69 = vector.broadcast %68 : f32 to vector<1x8xf32>
    %70 = arith.mulf %1, %69 : vector<1x8xf32>
    %71 = arith.addf %67, %70 : vector<1x8xf32>
    %c14 = arith.constant 14 : index
    %72 = memref.load %arg1[%c14] : memref<41xf32, #tpu.memory_space<smem>>
    %73 = vector.broadcast %72 : f32 to vector<1x8xf32>
    %74 = arith.mulf %2, %73 : vector<1x8xf32>
    %75 = arith.addf %71, %74 : vector<1x8xf32>
    %c15 = arith.constant 15 : index
    %76 = memref.load %arg1[%c15] : memref<41xf32, #tpu.memory_space<smem>>
    %77 = vector.broadcast %76 : f32 to vector<1x8xf32>
    %78 = arith.mulf %3, %77 : vector<1x8xf32>
    %79 = arith.addf %75, %78 : vector<1x8xf32>
    %c16 = arith.constant 16 : index
    %80 = memref.load %arg1[%c16] : memref<41xf32, #tpu.memory_space<smem>>
    %81 = vector.broadcast %80 : f32 to vector<1x8xf32>
    %82 = arith.mulf %4, %81 : vector<1x8xf32>
    %83 = arith.addf %79, %82 : vector<1x8xf32>
    %c17 = arith.constant 17 : index
    %84 = memref.load %arg1[%c17] : memref<41xf32, #tpu.memory_space<smem>>
    %85 = vector.broadcast %84 : f32 to vector<1x8xf32>
    %86 = arith.mulf %5, %85 : vector<1x8xf32>
    %87 = arith.addf %83, %86 : vector<1x8xf32>
    %cst_13 = arith.constant 0.000000e+00 : f32
    %88 = vector.broadcast %cst_13 : f32 to vector<1x8xf32>
    %89 = arith.maximumf %87, %88 : vector<1x8xf32>
    %c18 = arith.constant 18 : index
    %90 = memref.load %arg1[%c18] : memref<41xf32, #tpu.memory_space<smem>>
    %91 = vector.broadcast %90 : f32 to vector<1x8xf32>
    %92 = arith.mulf %0, %91 : vector<1x8xf32>
    %c27 = arith.constant 27 : index
    %93 = memref.load %arg1[%c27] : memref<41xf32, #tpu.memory_space<smem>>
    %94 = vector.broadcast %93 : f32 to vector<1x8xf32>
    %95 = arith.addf %92, %94 : vector<1x8xf32>
    %c19 = arith.constant 19 : index
    %96 = memref.load %arg1[%c19] : memref<41xf32, #tpu.memory_space<smem>>
    %97 = vector.broadcast %96 : f32 to vector<1x8xf32>
    %98 = arith.mulf %1, %97 : vector<1x8xf32>
    %99 = arith.addf %95, %98 : vector<1x8xf32>
    %c20 = arith.constant 20 : index
    %100 = memref.load %arg1[%c20] : memref<41xf32, #tpu.memory_space<smem>>
    %101 = vector.broadcast %100 : f32 to vector<1x8xf32>
    %102 = arith.mulf %2, %101 : vector<1x8xf32>
    %103 = arith.addf %99, %102 : vector<1x8xf32>
    %c21 = arith.constant 21 : index
    %104 = memref.load %arg1[%c21] : memref<41xf32, #tpu.memory_space<smem>>
    %105 = vector.broadcast %104 : f32 to vector<1x8xf32>
    %106 = arith.mulf %3, %105 : vector<1x8xf32>
    %107 = arith.addf %103, %106 : vector<1x8xf32>
    %c22 = arith.constant 22 : index
    %108 = memref.load %arg1[%c22] : memref<41xf32, #tpu.memory_space<smem>>
    %109 = vector.broadcast %108 : f32 to vector<1x8xf32>
    %110 = arith.mulf %4, %109 : vector<1x8xf32>
    %111 = arith.addf %107, %110 : vector<1x8xf32>
    %c23 = arith.constant 23 : index
    %112 = memref.load %arg1[%c23] : memref<41xf32, #tpu.memory_space<smem>>
    %113 = vector.broadcast %112 : f32 to vector<1x8xf32>
    %114 = arith.mulf %5, %113 : vector<1x8xf32>
    %115 = arith.addf %111, %114 : vector<1x8xf32>
    %cst_14 = arith.constant 0.000000e+00 : f32
    %116 = vector.broadcast %cst_14 : f32 to vector<1x8xf32>
    %117 = arith.maximumf %115, %116 : vector<1x8xf32>
    %c28 = arith.constant 28 : index
    %118 = memref.load %arg1[%c28] : memref<41xf32, #tpu.memory_space<smem>>
    %119 = vector.broadcast %118 : f32 to vector<1x8xf32>
    %120 = arith.mulf %33, %119 : vector<1x8xf32>
    %c36 = arith.constant 36 : index
    %121 = memref.load %arg1[%c36] : memref<41xf32, #tpu.memory_space<smem>>
    %122 = vector.broadcast %121 : f32 to vector<1x8xf32>
    %123 = arith.addf %120, %122 : vector<1x8xf32>
    %c29 = arith.constant 29 : index
    %124 = memref.load %arg1[%c29] : memref<41xf32, #tpu.memory_space<smem>>
    %125 = vector.broadcast %124 : f32 to vector<1x8xf32>
    %126 = arith.mulf %61, %125 : vector<1x8xf32>
    %127 = arith.addf %123, %126 : vector<1x8xf32>
    %c30 = arith.constant 30 : index
    %128 = memref.load %arg1[%c30] : memref<41xf32, #tpu.memory_space<smem>>
    %129 = vector.broadcast %128 : f32 to vector<1x8xf32>
    %130 = arith.mulf %89, %129 : vector<1x8xf32>
    %131 = arith.addf %127, %130 : vector<1x8xf32>
    %c31 = arith.constant 31 : index
    %132 = memref.load %arg1[%c31] : memref<41xf32, #tpu.memory_space<smem>>
    %133 = vector.broadcast %132 : f32 to vector<1x8xf32>
    %134 = arith.mulf %117, %133 : vector<1x8xf32>
    %135 = arith.addf %131, %134 : vector<1x8xf32>
    %cst_15 = arith.constant 0.000000e+00 : f32
    %136 = vector.broadcast %cst_15 : f32 to vector<1x8xf32>
    %137 = arith.maximumf %135, %136 : vector<1x8xf32>
    %c32 = arith.constant 32 : index
    %138 = memref.load %arg1[%c32] : memref<41xf32, #tpu.memory_space<smem>>
    %139 = vector.broadcast %138 : f32 to vector<1x8xf32>
    %140 = arith.mulf %33, %139 : vector<1x8xf32>
    %c37 = arith.constant 37 : index
    %141 = memref.load %arg1[%c37] : memref<41xf32, #tpu.memory_space<smem>>
    %142 = vector.broadcast %141 : f32 to vector<1x8xf32>
    %143 = arith.addf %140, %142 : vector<1x8xf32>
    %c33 = arith.constant 33 : index
    %144 = memref.load %arg1[%c33] : memref<41xf32, #tpu.memory_space<smem>>
    %145 = vector.broadcast %144 : f32 to vector<1x8xf32>
    %146 = arith.mulf %61, %145 : vector<1x8xf32>
    %147 = arith.addf %143, %146 : vector<1x8xf32>
    %c34 = arith.constant 34 : index
    %148 = memref.load %arg1[%c34] : memref<41xf32, #tpu.memory_space<smem>>
    %149 = vector.broadcast %148 : f32 to vector<1x8xf32>
    %150 = arith.mulf %89, %149 : vector<1x8xf32>
    %151 = arith.addf %147, %150 : vector<1x8xf32>
    %c35 = arith.constant 35 : index
    %152 = memref.load %arg1[%c35] : memref<41xf32, #tpu.memory_space<smem>>
    %153 = vector.broadcast %152 : f32 to vector<1x8xf32>
    %154 = arith.mulf %117, %153 : vector<1x8xf32>
    %155 = arith.addf %151, %154 : vector<1x8xf32>
    %cst_16 = arith.constant 0.000000e+00 : f32
    %156 = vector.broadcast %cst_16 : f32 to vector<1x8xf32>
    %157 = arith.maximumf %155, %156 : vector<1x8xf32>
    %c38 = arith.constant 38 : index
    %158 = memref.load %arg1[%c38] : memref<41xf32, #tpu.memory_space<smem>>
    %159 = vector.broadcast %158 : f32 to vector<1x8xf32>
    %160 = arith.mulf %137, %159 : vector<1x8xf32>
    %c40 = arith.constant 40 : index
    %161 = memref.load %arg1[%c40] : memref<41xf32, #tpu.memory_space<smem>>
    %162 = vector.broadcast %161 : f32 to vector<1x8xf32>
    %163 = arith.addf %160, %162 : vector<1x8xf32>
    %c39 = arith.constant 39 : index
    %164 = memref.load %arg1[%c39] : memref<41xf32, #tpu.memory_space<smem>>
    %165 = vector.broadcast %164 : f32 to vector<1x8xf32>
    %166 = arith.mulf %157, %165 : vector<1x8xf32>
    %167 = arith.addf %163, %166 : vector<1x8xf32>
    %cst_17 = arith.constant 5.000000e-01 : f32
    %168 = vector.broadcast %cst_17 : f32 to vector<1x8xf32>
    %169 = arith.mulf %168, %167 : vector<1x8xf32>
    %170 = math.tanh %169 : vector<1x8xf32>
    %cst_18 = arith.constant 5.000000e-01 : f32
    %171 = vector.broadcast %cst_18 : f32 to vector<1x8xf32>
    %172 = arith.mulf %171, %170 : vector<1x8xf32>
    %cst_19 = arith.constant 5.000000e-01 : f32
    %173 = vector.broadcast %cst_19 : f32 to vector<1x8xf32>
    %174 = arith.addf %172, %173 : vector<1x8xf32>
    %c0_20 = arith.constant 0 : index
    %c0_21 = arith.constant 0 : index
    %175 = vector.load %arg3[%c0_20, %c0_21] : memref<1x8xf32, #tpu.memory_space<vmem>>, vector<1x8xf32>
    tpu.vector_store %arg3[%c0_20, %c0_21], %174 {strides = array<i32>} : memref<1x8xf32, #tpu.memory_space<vmem>>, vector<1x8xf32>,
    return
  }
  func.func @transform_0(%arg0: i32) -> i32 {
    %c0_i32 = arith.constant 0 : i32
    %c0_i32_0 = arith.constant 0 : i32
    return %c0_i32 : i32
  }
  func.func @transform_1(%arg0: i32) -> (i32, i32) {
    %c0_i32 = arith.constant 0 : i32
    %c0_i32_0 = arith.constant 0 : i32
    return %c0_i32, %arg0 : i32, i32
  }
  func.func @transform_2(%arg0: i32) -> (i32, i32) {
    %c0_i32 = arith.constant 0 : i32
    %c0_i32_0 = arith.constant 0 : i32
    return %c0_i32, %arg0 : i32, i32
  }
}

</mosaic_0001>

<bundles_post_ra>
// kernel: tpu_custom_call.1
= control target key start
LH: loop header
LB: loop body
LE: loop exit
PB: predicated region body
PF: predicated region fallthrough
CT: control target
= control target key end

     0   :  { %7 = vsyncpa [#allocation5], 0  ;;  %s516_s0 = inlined_call_operand.hbm [shape: f32[41], index: 0, kind: input, shape index: {}]   ;;  %s517_s1 = inlined_call_operand.hbm [shape: f32[6,8], index: 1, kind: input, shape index: {}]   ;;  %s518_s2 = inlined_call_operand.hbm [shape: f32[1,8], index: 2, kind: output, shape index: {}]  }
   0x1   :  { %8 = vsyncpa [#allocation3], 0 }
   0x2   :  { %9 = vsyncpa [#allocation4], 0  ;;  %s264_s11 = scalar_lea.hbm %s516_s0, 16 }
   0x3   :  { %p265_p0 = scmp.ne.s32.totalorder %s516_s0, %s264_s11  ;;  %p268_p1 = scmp.lt.u32.totalorder %s264_s11, %s516_s0 }
   0x5   :  { %p270_p2 = pnand %p268_p1, %p265_p0 }
   0x7   :  { %273 = shalt.err (!%p270_p2)
}
   0x8   :  { %s324_s16 = smov [#allocation2]   ;;  %s325_s19 = smov [#allocation6]  }
   0x9   :  { %17 = dma.hbm_to_smem %s516_s0, 16, %s324_s16, [#allocation5]  }
   0xa   :  { %s24_s20 = sshll.u32 %s325_s19, 4  ;;  %s274_s23 = scalar_lea.hbm %s517_s1, 128  ;;  %s25_s20 = int_to_ptr.vmem [resolvable:$true] %s24_s20 }
   0xb   :  { %p275_p3 = scmp.ne.s32.totalorder %s517_s1, %s274_s23  ;;  %p278_p4 = scmp.lt.u32.totalorder %s274_s23, %s517_s1 }
   0xd   :  { %p280_p5 = pnand %p278_p4, %p275_p3 }
   0xf   :  { %283 = shalt.err (!%p280_p5)
}
  0x10   :  { %s284_s28 = scalar_lea.vmem %s25_s20, 128  ;;  %p289_p7 = scmp.lt.s32.totalorder %s25_s20, %s25_s20 }
  0x11   :  { %p285_p6 = scmp.ne.s32.totalorder %s25_s20, %s284_s28  ;;  %p290_p8 = scmp.lt.s32.totalorder %s284_s28, %s284_s28 }
  0x13   :  { %p291_p9 = por %p290_p8, %p289_p7 }
  0x15   :  { %p292_p10 = pnand %p291_p9, %p285_p6 }
  0x17   :  { %295 = shalt.err (!%p292_p10)
}
  0x18   :  { %27 = dma.hbm_to_vmem [thread:$0]  %s517_s1, 128, %s25_s20, [#allocation3]  }
  0x19   :  { %318 = dma.done.wait [#allocation5], 16  }
  0x1a   :  { %319 = vsyncadd [#allocation5], 4294967280 }
  0x1b   :  { %320 = dma.done.wait [#allocation3], 128  }
  0x1c   :  { %321 = vsyncadd [#allocation3], 4294967168 }
  0x1d   :  { %34 = sfence }
  0x1e   :  { %s41_s30 = sld [smem:[#allocation2]]  ;;  %s220_s4 = sld [smem:[#allocation2 + $0x1]]  ;;  %v370_v0 = vld [vmem:[#allocation6] sm:$0x1]  ;;  %v376_v1 = vld [vmem:[#allocation6 + $0x1] sm:$0x1] }
  0x1f   :  { %s366_s3 = sld [smem:[#allocation2 + $0x18]]  ;;  %s221_s5 = sld [smem:[#allocation2 + $0x2]]  ;;  %v382_v2 = vld [vmem:[#allocation6 + $0x2] sm:$0x1]  ;;  %v388_v3 = vld [vmem:[#allocation6 + $0x3] sm:$0x1] }
  0x20   :  { %s222_s6 = sld [smem:[#allocation2 + $0x3]]  ;;  %s368_s7 = sld [smem:[#allocation2 + $0x4]]  ;;  %v395_v6 = vld [vmem:[#allocation6 + $0x4] sm:$0x1]  ;;  %v408_v13 = vld [vmem:[#allocation6 + $0x5] sm:$0x1] }
  0x21   :  { %s372_s8 = sld [smem:[#allocation2 + $0x5]]  ;;  %s374_s9 = sld [smem:[#allocation2 + $0x6]]  ;;  %vm201_vm0 = vcmask 57344  }
  0x22   :  { %s378_s1 = sld [smem:[#allocation2 + $0x19]]  ;;  %s380_s10 = sld [smem:[#allocation2 + $0x7]] }
  0x23   :  { %s384_s11 = sld [smem:[#allocation2 + $0x8]]  ;;  %s386_s12 = sld [smem:[#allocation2 + $0x9]] }
  0x24   :  { %v42_v4 = vstv %s41_s30  ;;  %s391_s13 = sld [smem:[#allocation2 + $0xa]]  ;;  %s393_s14 = sld [smem:[#allocation2 + $0xb]]  ;;  %v48_v8 = vstv %s220_s4 }
  0x25   :  { %v45_v5 = vstv %s366_s3  ;;  %v43_v7 = vmul.f32 %v42_v4, %v370_v0  ;;  %v52_v9 = vstv %s221_s5  ;;  %s398_s15 = sld [smem:[#allocation2 + $0xc]]  ;;  %s400_s16 = sld [smem:[#allocation2 + $0x1a]]  ;;  %v49_v10 = vmul.f32 %v48_v8, %v376_v1 }
  0x26   :  { %v56_v11 = vstv %s222_s6  ;;  %v60_v12 = vstv %s368_s7  ;;  %s404_s17 = sld [smem:[#allocation2 + $0xd]]  ;;  %s406_s18 = sld [smem:[#allocation2 + $0xe]]  ;;  %v53_v15 = vmul.f32 %v52_v9, %v382_v2 }
  0x27   :  { %v46_v14 = vadd.f32 %v45_v5, %v43_v7  ;;  %v57_v16 = vmul.f32 %v56_v11, %v388_v3  ;;  %v64_v17 = vstv %s372_s8  ;;  %s413_s19 = sld [smem:[#allocation2 + $0xf]]  ;;  %s415_s20 = sld [smem:[#allocation2 + $0x10]]  ;;  %v61_v18 = vmul.f32 %v60_v12, %v395_v6 }
  0x28   :  { %v69_v19 = vstv %s374_s9  ;;  %v72_v20 = vstv %s378_s1  ;;  %v75_v21 = vstv %s380_s10  ;;  %s421_s21 = sld [smem:[#allocation2 + $0x11]]  ;;  %s423_s22 = sld [smem:[#allocation2 + $0x12]]  ;;  %v65_v26 = vmul.f32 %v64_v17, %v408_v13 }
  0x29   :  { %v50_v22 = vadd.f32 %v49_v10, %v46_v14  ;;  %v70_v23 = vmul.f32 %v69_v19, %v370_v0  ;;  %v76_v24 = vmul.f32 %v75_v21, %v376_v1  ;;  %v79_v25 = vstv %s384_s11  ;;  %s428_s23 = sld [smem:[#allocation2 + $0x1b]]  ;;  %s436_s25 = sld [smem:[#allocation2 + $0x14]] }
  0x2a   :  { %s430_s24 = sld [smem:[#allocation2 + $0x13]]  ;;  %v80_v27 = vmul.f32 %v79_v25, %v382_v2  ;;  %v83_v28 = vstv %s386_s12  ;;  %v87_v29 = vstv %s391_s13  ;;  %s438_s26 = sld [smem:[#allocation2 + $0x15]]  ;;  %v91_v33 = vstv %s393_s14 }
  0x2b   :  { %v54_v30 = vadd.f32 %v53_v15, %v50_v22  ;;  %v73_v31 = vadd.f32 %v72_v20, %v70_v23  ;;  %v84_v32 = vmul.f32 %v83_v28, %v388_v3  ;;  %v88_v34 = vmul.f32 %v87_v29, %v395_v6  ;;  %s446_s27 = sld [smem:[#allocation2 + $0x16]]  ;;  %s450_s28 = sld [smem:[#allocation2 + $0x17]] }
  0x2c   :  { %v96_v35 = vstv %s398_s15  ;;  %v99_v36 = vstv %s400_s16  ;;  %v102_v37 = vstv %s404_s17  ;;  %v92_v42 = vmul.f32 %v91_v33, %v408_v13  ;;  %s456_s0 = sld [smem:[#allocation2 + $0x1c]]  ;;  %s461_s30 = sld [smem:[#allocation2 + $0x1d]] }
  0x2d   :  { %v58_v38 = vadd.f32 %v57_v16, %v54_v30  ;;  %v77_v39 = vadd.f32 %v76_v24, %v73_v31  ;;  %v97_v40 = vmul.f32 %v96_v35, %v370_v0  ;;  %v103_v41 = vmul.f32 %v102_v37, %v376_v1  ;;  %s458_s29 = sld [smem:[#allocation2 + $0x24]]  ;;  %s467_s3 = sld [smem:[#allocation2 + $0x1e]] }
  0x2e   :  { %v106_v43 = vstv %s406_s18  ;;  %v110_v44 = vstv %s413_s19  ;;  %v114_v45 = vstv %s415_s20  ;;  %v118_v52 = vstv %s421_s21  ;;  %s469_s4 = sld [smem:[#allocation2 + $0x20]]  ;;  %s472_s5 = sld [smem:[#allocation2 + $0x25]] }
  0x2f   :  { %v62_v46 = vadd.f32 %v61_v18, %v58_v38  ;;  %v81_v47 = vadd.f32 %v80_v27, %v77_v39  ;;  %v100_v48 = vadd.f32 %v99_v36, %v97_v40  ;;  %v107_v49 = vmul.f32 %v106_v43, %v382_v2  ;;  %s478_s6 = sld [smem:[#allocation2 + $0x21]]  ;;  %s480_s7 = sld [smem:[#allocation2 + $0x22]] }
  0x30   :  { %v111_v50 = vmul.f32 %v110_v44, %v388_v3  ;;  %v115_v51 = vmul.f32 %v114_v45, %v395_v6  ;;  %v123_v53 = vstv %s423_s22  ;;  %v126_v58 = vstv %s428_s23  ;;  %s492_s8 = sld [smem:[#allocation2 + $0x1f]]  ;;  %s494_s9 = sld [smem:[#allocation2 + $0x23]] }
  0x31   :  { %v66_v54 = vadd.f32 %v65_v26, %v62_v46  ;;  %v85_v55 = vadd.f32 %v84_v32, %v81_v47  ;;  %v104_v56 = vadd.f32 %v103_v41, %v100_v48  ;;  %v124_v57 = vmul.f32 %v123_v53, %v370_v0  ;;  %s256_s1 = sld [smem:[#allocation2 + $0x26]]  ;;  %s258_s10 = sld [smem:[#allocation2 + $0x27]] }
  0x32   :  { %v129_v59 = vstv %s430_s24  ;;  %v133_v60 = vstv %s436_s25  ;;  %v137_v61 = vstv %s438_s26  ;;  %v119_v0 = vmul.f32 %v118_v52, %v408_v13  ;;  %s257_s11 = sld [smem:[#allocation2 + $0x28]]  ;;  %s326_s12 = smov [#allocation7]  }
  0x33   :  { %v67_v62 = vmax.f32 %v66_v54, 0.0  ;;  %v89_v63 = vadd.f32 %v88_v34, %v85_v55  ;;  %v108_v4 = vadd.f32 %v107_v49, %v104_v56  ;;  %v127_v5 = vadd.f32 %v126_v58, %v124_v57  ;;  %s209_s13 = sshll.u32 %s326_s12, 4  ;;  %s210_s13 = int_to_ptr.vmem [resolvable:$true] %s209_s13 }
  0x34   :  { %v130_v7 = vmul.f32 %v129_v59, %v376_v1  ;;  %v134_v8 = vmul.f32 %v133_v60, %v382_v2  ;;  %v141_v9 = vstv %s446_s27  ;;  %v138_v12 = vmul.f32 %v137_v61, %v388_v3  ;;  %s296_s14 = scalar_lea.vmem %s210_s13, 16  ;;  %s300_s15 = scalar_lea.vmem %s210_s13, 32 }
  0x35   :  { %v93_v10 = vadd.f32 %v92_v42, %v89_v63  ;;  %v112_v11 = vadd.f32 %v111_v50, %v108_v4  ;;  %v145_v14 = vstv %s450_s28  ;;  %v142_v16 = vmul.f32 %v141_v9, %v395_v6  ;;  %p297_p11 = scmp.ne.s32.totalorder %s210_s13, %s296_s14  ;;  %p301_p12 = scmp.lt.s32.totalorder %s210_s13, %s210_s13 }
  0x36   :  { %v131_v15 = vadd.f32 %v130_v7, %v127_v5  ;;  %v150_v17 = vstv %s456_s0  ;;  %v153_v18 = vstv %s458_s29  ;;  %v156_v2 = vstv %s461_s30  ;;  %p302_p13 = scmp.lt.s32.totalorder %s300_s15, %s296_s14 }
  0x37   :  { %v94_v19 = vmax.f32 %v93_v10, 0.0  ;;  %v116_v20 = vadd.f32 %v115_v51, %v112_v11  ;;  %v151_v1 = vmul.f32 %v150_v17, %v67_v62  ;;  %v146_v3 = vmul.f32 %v145_v14, %v408_v13 }
  0x38   :  { %v135_v21 = vadd.f32 %v134_v8, %v131_v15  ;;  %v160_v22 = vstv %s467_s3  ;;  %v169_v23 = vstv %s469_s4  ;;  %v172_v28 = vstv %s472_s5  ;;  %p303_p0 = por %p302_p13, %p301_p12 }
  0x39   :  { %v120_v24 = vadd.f32 %v119_v0, %v116_v20  ;;  %v154_v6 = vadd.f32 %v153_v18, %v151_v1  ;;  %v157_v25 = vmul.f32 %v156_v2, %v94_v19  ;;  %v170_v26 = vmul.f32 %v169_v23, %v67_v62 }
  0x3a   :  { %v139_v27 = vadd.f32 %v138_v12, %v135_v21  ;;  %v175_v29 = vstv %s478_s6  ;;  %v179_v30 = vstv %s480_s7  ;;  %v164_v39 = vstv %s492_s8  ;;  %p304_p1 = pnand %p303_p0, %p297_p11 }
  0x3b   :  { %v121_v31 = vmax.f32 %v120_v24, 0.0  ;;  %v173_v32 = vadd.f32 %v172_v28, %v170_v26  ;;  %v176_v33 = vmul.f32 %v175_v29, %v94_v19  ;;  %v158_v35 = vadd.f32 %v157_v25, %v154_v6 }
  0x3c   :  { %v143_v34 = vadd.f32 %v142_v16, %v139_v27  ;;  %v183_v40 = vstv %s494_s9  ;;  %v188_v48 = vstv %s256_s1  ;;  %v194_v49 = vstv %s258_s10 }
  0x3d   :  { %v161_v36 = vmul.f32 %v160_v22, %v121_v31  ;;  %v177_v37 = vadd.f32 %v176_v33, %v173_v32  ;;  %v180_v13 = vmul.f32 %v179_v30, %v121_v31  ;;  %v191_v52 = vstv %s257_s11 }
  0x3e   :  { %v147_v38 = vadd.f32 %v146_v3, %v143_v34 }
  0x3f   :  { %v162_v42 = vadd.f32 %v161_v36, %v158_v35  ;;  %v181_v43 = vadd.f32 %v180_v13, %v177_v37 }
  0x40   :  { %v148_v41 = vmax.f32 %v147_v38, 0.0 }
  0x42   :  { %v165_v44 = vmul.f32 %v164_v39, %v148_v41  ;;  %v184_v45 = vmul.f32 %v183_v40, %v148_v41 }
  0x44   :  { %v166_v46 = vadd.f32 %v165_v44, %v162_v42  ;;  %v185_v47 = vadd.f32 %v184_v45, %v181_v43 }
  0x46   :  { %v167_v50 = vmax.f32 %v166_v46, 0.0  ;;  %v186_v51 = vmax.f32 %v185_v47, 0.0 }
  0x48   :  { %v189_v53 = vmul.f32 %v188_v48, %v167_v50  ;;  %v195_v54 = vmul.f32 %v194_v49, %v186_v51 }
  0x4a   :  { %v192_v55 = vadd.f32 %v191_v52, %v189_v53 }
  0x4c   :  { %v196_v56 = vadd.f32 %v195_v54, %v192_v55 }
  0x4e   :  { %v197_v57 = vmul.f32 0.5, %v196_v56 }
  0x50   :  { %262 = vtanh.f32 %v197_v57 }
  0x5a   :  { %v263_v58 = vpop.eup %262 }
  0x5b   :  { %v199_v59 = vmul.f32 0.5, %v263_v58 }
  0x5d   :  { %v200_v60 = vadd.f32 0.5, %v199_v59 }
  0x5f   :  { %202 = vst.msk [vmem:[#allocation7] sm:$0x1] %vm201_vm0, %v200_v60 }
  0x60   :  { %307 = shalt.err (!%p304_p1)
}
  0x61   :  { %s308_s18 = scalar_lea.hbm %s518_s2, 16 }
  0x62   :  { %p309_p2 = scmp.ne.s32.totalorder %s518_s2, %s308_s18  ;;  %p312_p3 = scmp.lt.u32.totalorder %s308_s18, %s518_s2 }
  0x64   :  { %p314_p4 = pnand %p312_p3, %p309_p2 }
  0x66   :  { %317 = shalt.err (!%p314_p4)
}
  0x67   :  { %212 = dma.vmem_to_hbm [thread:$0]  %s210_s13, 16, %s518_s2, [#allocation4]  }
  0x68   :  { %322 = dma.done.wait [#allocation4], 16  }
  0x69   :  { %323 = vsyncadd [#allocation4], 4294967280 }
  0x6a   :  { %216 = vsyncpa [#allocation3], 1 }
  0x6b   :  { %217 = vsyncpa [#allocation4], 1 }
  0x6c   :  { %218 = vsyncpa [#allocation5], 1 }

</bundles_post_ra>
